<compile_context>
chip_gen: v7x
topology: tpu7x:2x2x1
jax: 0.10.0
libtpu: 0.0.40
codegen_flags: <defaults>
</compile_context>

<pallas_src>
import jax
import jax.numpy as jnp
from jax.experimental import pallas as pl
from jax.experimental.pallas import tpu as pltpu


# ---------------------------------------------------------------------------
# Small integer helpers
# ---------------------------------------------------------------------------
def _round_up(n, m):
    return ((n + m - 1) // m) * m


def _round_down(n, m):
    return (n // m) * m


def _cdiv(a, b):
    return (a + b - 1) // b


def _vmem_capacity_bytes():
    """Per-TensorCore VMEM (generation aware: 128 MiB v5e/v6e, 64 MiB v7x)."""
    try:
        cap = int(pltpu.get_tpu_info().vmem_capacity_bytes)
        if cap > 0:
            return cap
    except Exception:
        pass
    return 64 << 20  # conservative fallback (v7x per-core figure)


def _block_vmem_bytes(tb, thw, C, itemsize):
    """VMEM of one grid step: double-buffered input, output and weight blocks,
    including sublane (8) and lane (128) padding."""
    lanes = _round_up(thw, 128)
    in_b = _round_up(tb * C, 8) * lanes * itemsize
    out_b = _round_up(tb, 8) * lanes * 4                      # f32 output
    w_b = _round_up(tb, 8) * _round_up(tb * C, 128) * 4       # resident weight
    return 2 * (in_b + out_b + w_b)


def _choose_tiles(B, C, HW, itemsize, vmem_capacity):
    """Pick (batch_tile tb, lane_tile thw).

    Targets ~4 MiB of streamed feature bytes per grid step, keeps >= 8 grid
    steps when the problem is large enough (>= 2-4 steps per v7x TensorCore),
    never fragments tiny problems below ~1 MiB blocks, and respects a ~55%
    VMEM budget on every generation (lane padding included).
    """
    budget = (vmem_capacity * 11) // 20                   # headroom for compiler temps
    target = min(4 << 20, max(budget // 4, 1 << 20))      # feature bytes per step

    # Spatial (lane) tile: full HW unless a single image exceeds the target.
    if C * _round_up(HW, 128) * itemsize <= target or HW <= 128:
        thw = HW
    else:
        thw = max(128, _round_down(target // (C * itemsize), 128))
        thw = min(thw, _round_down(HW, 128))
    n_hw = _cdiv(HW, thw)

    per_image = C * _round_up(min(thw, HW), 128) * itemsize
    tb = max(1, min(B, target // max(per_image, 1)))

    # Enough grid steps for pipelining / megacore, but don't shrink blocks
    # below ~1 MiB (per-step overhead would dominate a tiny problem).
    while tb > 1 and _cdiv(B, tb) * n_hw < 8 and (tb - 1) * per_image >= (1 << 20):
        tb -= 1

    # Prefer sublane-dense output stores and (when cheap) no partial batch
    # block: tb == B, a multiple of 8, or an exact divisor of B.
    if tb < B:
        if tb >= 8:
            tb = _round_down(tb, 8)
        else:
            while B % tb:
                tb -= 1

    # Hard VMEM ceiling.
    while tb > 1 and _block_vmem_bytes(tb, thw, C, itemsize) > budget:
        tb -= 1
    while thw > 128 and _block_vmem_bytes(tb, thw, C, itemsize) > budget:
        thw = max(128, _round_down(thw // 2, 128))
    return tb, thw


# ---------------------------------------------------------------------------
# Kernel
# ---------------------------------------------------------------------------
def _make_kernel(tb, C, B, needs_row_mask):
    rows_per_block = tb * C
    total_rows = B * C

    def kernel(x_ref, w_ref, b_ref, out_ref):
        """One grid step = tb batch elements x thw spatial positions.

        x_ref   : (tb*C, thw)   flattened NCHW feature block (C on sublanes)
        w_ref   : (tb, tb*C)    block-diagonal 1x1-conv weight (VMEM resident)
        b_ref   : (1,)  SMEM    conv bias (scalar, f32)
        out_ref : (tb, thw) f32 sigmoid(conv1x1(x)) for this tile
        """
        x = x_ref[...]
        if needs_row_mask:  # only compiled in when B % tb != 0 (last block partial)
            i = pl.program_id(0)
            row = i * rows_per_block + jax.lax.broadcasted_iota(
                jnp.int32, x_ref.shape, 0)
            x = jnp.where(row < total_rows, x, 0)

        # One batched contraction on the MXU: all tb output rows at once.
        z = jnp.dot(w_ref[...], x, preferred_element_type=jnp.float32)  # (tb, thw)
        z = z + b_ref[0]
        # Exact sigmoid; exp overflow -> inf -> 0.0 is the correct limit.
        out_ref[...] = (1.0 / (1.0 + jnp.exp(-z))).astype(out_ref.dtype)

    return kernel


# ---------------------------------------------------------------------------
# Wrapper
# ---------------------------------------------------------------------------
def domain_classifier_forward(x_nchw, w, b, *, tb=None, thw=None):
    """x_nchw: (B, C, H, W); w: (1, C) (or (1, C, 1, 1)) conv weight; b: (1,)."""
    B, C, H, W = x_nchw.shape
    HW = H * W
    itemsize = x_nchw.dtype.itemsize

    vmem_cap = _vmem_capacity_bytes()
    auto_tb, auto_thw = _choose_tiles(B, C, HW, itemsize, vmem_cap)
    tb = auto_tb if tb is None else tb
    thw = auto_thw if thw is None else thw

    nb = _cdiv(B, tb)
    nh = _cdiv(HW, thw)
    needs_row_mask = (B % tb) != 0

    x2 = x_nchw.reshape(B * C, HW)  # free row-major view; no transpose, 1 HBM read

    # Block-diagonal weight: row t carries w at columns [t*C, (t+1)*C), so one
    # (tb, tb*C) @ (tb*C, thw) matmul computes the 1x1 conv for tb images.
    w_bd = jnp.kron(jnp.eye(tb, dtype=jnp.float32),
                    w.reshape(1, C).astype(jnp.float32))
    w_bd = w_bd.astype(x_nchw.dtype)            # MXU-native dtype (bf16 in, bf16 w)
    b1 = b.reshape(1).astype(jnp.float32)

    kernel = _make_kernel(tb, C, B, needs_row_mask)

    vmem_needed = _block_vmem_bytes(tb, thw, C, itemsize)
    vmem_limit = int(min(vmem_cap, max(vmem_needed + (4 << 20), 32 << 20)))

    cost = pl.CostEstimate(
        flops=2 * B * C * HW,
        transcendentals=B * HW,
        bytes_accessed=B * C * HW * itemsize + B * HW * 4
        + int(w_bd.size) * w_bd.dtype.itemsize,
    )

    out = pl.pallas_call(
        kernel,
        out_shape=jax.ShapeDtypeStruct((B, HW), jnp.float32),  # f32, like PyTorch
        grid_spec=pltpu.PrefetchScalarGridSpec(
            num_scalar_prefetch=0,
            grid=(nb, nh),
            in_specs=[
                pl.BlockSpec((tb * C, thw), lambda i, j: (i, j)),      # features
                pl.BlockSpec((tb, tb * C), lambda i, j: (0, 0)),       # weight
                pl.BlockSpec(memory_space=pltpu.MemorySpace.SMEM),     # bias
            ],
            out_specs=pl.BlockSpec((tb, thw), lambda i, j: (i, j)),
        ),
        compiler_params=pltpu.CompilerParams(
            dimension_semantics=("parallel", "parallel"),
            vmem_limit_bytes=vmem_limit,
        ),
        cost_estimate=cost,
    )(x2, w_bd, b1)

    # Match the PyTorch 1x1-conv output shape: (B, 1, H, W).
    return out.reshape(B, 1, H, W)


# ---------------------------------------------------------------------------
# Pure-JAX reference + demo
# ---------------------------------------------------------------------------
def domain_classifier_reference(x_nchw, w, b):
    z = jnp.einsum('bchw,oc->bohw', x_nchw, w.reshape(1, -1)) + b.reshape(1, -1, 1, 1)
    return jax.nn.sigmoid(z)


def xavier_uniform(key, shape, fan_in, fan_out):
    limit = (6.0 / (fan_in + fan_out)) ** 0.5
    return jax.random.uniform(key, shape, jnp.float32, -limit, limit)


if __name__ == "__main__":
    # Small TPU-friendly shapes (real use: num_feature ~ 1024-2048, 14x14 maps).
    B, C, H, W = 2, 64, 16, 16

    key = jax.random.PRNGKey(0)
    k_x, k_w, k_b = jax.random.split(key, 3)

    x = jax.random.normal(k_x, (B, C, H, W), jnp.float32)
    # fc: Conv2d(C, 1, 1) -> weight (1, C) (1x1 kernel squeezed), bias (1,)
    w = xavier_uniform(k_w, (1, C), fan_in=C, fan_out=1)
    b = jax.random.uniform(k_b, (1,), jnp.float32, -0.01, 0.01)

    out = jax.block_until_ready(domain_classifier_forward(x, w, b))
    ref = jax.block_until_ready(domain_classifier_reference(x, w, b))

    assert out.shape == (B, 1, H, W), out.shape
    assert out.dtype == jnp.float32, out.dtype
    assert jnp.allclose(out, ref, atol=1e-5, rtol=1e-5), \
        float(jnp.max(jnp.abs(out - ref)))

    print("KERNEL_OK")
</pallas_src>

<mosaic_0001>
module attributes {stable_mosaic.version = 11 : i64} {
  func.func @kernel(%arg0: i32, %arg1: i32, %arg2: memref<128x256xf32, #tpu.memory_space<vmem>>, %arg3: memref<2x128xf32, #tpu.memory_space<vmem>>, %arg4: memref<1xf32, #tpu.memory_space<smem>>, %arg5: memref<2x256xf32, #tpu.memory_space<vmem>>) attributes {dimension_semantics = [#tpu.dimension_semantics<parallel>, #tpu.dimension_semantics<parallel>], iteration_bounds = array<i64: 1, 1>, scalar_prefetch = 0 : i64, scratch_operands = 0 : i64, tpu.core_type = #tpu.core_type<tc>, window_params = [{transform_indices = @transform_0, window_bounds = array<i64: 128, 256>}, {pipeline_mode = #tpu.pipeline_mode<synchronous>, transform_indices = @transform_1, window_bounds = array<i64: 2, 128>}, {transform_indices = @transform_2, window_bounds = array<i64: 1>}, {transform_indices = @transform_3, window_bounds = array<i64: 2, 256>}]} {
    %c0 = arith.constant 0 : index
    %c0_0 = arith.constant 0 : index
    %0 = vector.load %arg2[%c0, %c0_0] : memref<128x256xf32, #tpu.memory_space<vmem>>, vector<128x256xf32>
    %c0_1 = arith.constant 0 : index
    %c0_2 = arith.constant 0 : index
    %1 = vector.load %arg3[%c0_1, %c0_2] : memref<2x128xf32, #tpu.memory_space<vmem>>, vector<2x128xf32>
    %cst = arith.constant dense<0.000000e+00> : vector<2x256xf32>
    %2 = tpu.matmul %1, %0, %cst {dimension_numbers = #tpu.dot_dimension_numbers<[1], [0], [0], [1], [0, 0, 1, 1], [], []>} : vector<2x128xf32>, vector<128x256xf32>, vector<2x256xf32> -> vector<2x256xf32>
    %c0_3 = arith.constant 0 : index
    %3 = memref.load %arg4[%c0_3] : memref<1xf32, #tpu.memory_space<smem>>
    %4 = vector.broadcast %3 : f32 to vector<2x256xf32>
    %5 = arith.addf %2, %4 : vector<2x256xf32>
    %cst_4 = arith.constant 0.000000e+00 : f32
    %6 = vector.broadcast %cst_4 : f32 to vector<2x256xf32>
    %7 = arith.subf %6, %5 : vector<2x256xf32>
    %8 = math.exp %7 : vector<2x256xf32>
    %cst_5 = arith.constant 1.000000e+00 : f32
    %9 = vector.broadcast %cst_5 : f32 to vector<2x256xf32>
    %10 = arith.addf %9, %8 : vector<2x256xf32>
    %cst_6 = arith.constant 1.000000e+00 : f32
    %11 = vector.broadcast %cst_6 : f32 to vector<2x256xf32>
    %12 = arith.divf %11, %10 : vector<2x256xf32>
    %c0_7 = arith.constant 0 : index
    %c0_8 = arith.constant 0 : index
    %13 = vector.load %arg5[%c0_7, %c0_8] : memref<2x256xf32, #tpu.memory_space<vmem>>, vector<2x256xf32>
    tpu.vector_store %arg5[%c0_7, %c0_8], %12 {strides = array<i32>} : memref<2x256xf32, #tpu.memory_space<vmem>>, vector<2x256xf32>,
    return
  }
  func.func @transform_0(%arg0: i32, %arg1: i32) -> (i32, i32) {
    %c0_i32 = arith.constant 0 : i32
    return %arg0, %arg1 : i32, i32
  }
  func.func @transform_1(%arg0: i32, %arg1: i32) -> (i32, i32) {
    %c0_i32 = arith.constant 0 : i32
    %c0_i32_0 = arith.constant 0 : i32
    %c0_i32_1 = arith.constant 0 : i32
    return %c0_i32, %c0_i32_0 : i32, i32
  }
  func.func @transform_2(%arg0: i32, %arg1: i32) -> i32 {
    %c0_i32 = arith.constant 0 : i32
    %c0_i32_0 = arith.constant 0 : i32
    return %c0_i32 : i32
  }
  func.func @transform_3(%arg0: i32, %arg1: i32) -> (i32, i32) {
    %c0_i32 = arith.constant 0 : i32
    return %arg0, %arg1 : i32, i32
  }
}

</mosaic_0001>

<bundles_post_ra>
// kernel: tpu_custom_call.1
= control target key start
LH: loop header
LB: loop body
LE: loop exit
PB: predicated region body
PF: predicated region fallthrough
CT: control target
= control target key end

     0   :  { %9 = vsyncpa [#allocation4], 0  ;;  %s324_s0 = inlined_call_operand.hbm [shape: f32[128,256], index: 0, kind: input, shape index: {}]   ;;  %s325_s1 = inlined_call_operand.vmem [shape: f32[2,128], index: 1, kind: input, shape index: {}]   ;;  %s326_s2 = inlined_call_operand.<no memory space> [shape: f32[1], index: 2, kind: input, shape index: {}]   ;;  %s327_s3 = inlined_call_operand.hbm [shape: f32[2,256], index: 3, kind: output, shape index: {}]  }
   0x1   :  { %10 = vsyncpa [#allocation5], 0  ;;  %s269_s12 = smov [#allocation3]   ;;  %s221_s16 = scalar_lea.hbm %s324_s0, 4096 }
   0x2   :  { %s16_s13 = sshll.u32 %s269_s12, 4  ;;  %p222_p0 = scmp.ne.s32.totalorder %s324_s0, %s221_s16  ;;  %s17_s13 = int_to_ptr.vmem [resolvable:$true] %s16_s13 }
   0x3   :  { %p225_p1 = scmp.lt.u32.totalorder %s221_s16, %s324_s0 }
   0x5   :  { %p227_p2 = pnand %p225_p1, %p222_p0 }
   0x7   :  { %230 = shalt.err (!%p227_p2)
}
   0x8   :  { %s231_s21 = scalar_lea.vmem %s17_s13, 4096  ;;  %p236_p4 = scmp.lt.s32.totalorder %s17_s13, %s17_s13 }
   0x9   :  { %p232_p3 = scmp.ne.s32.totalorder %s17_s13, %s231_s21  ;;  %p237_p5 = scmp.lt.s32.totalorder %s231_s21, %s231_s21 }
   0xb   :  { %p238_p6 = por %p237_p5, %p236_p4 }
   0xd   :  { %p239_p7 = pnand %p238_p6, %p232_p3 }
   0xf   :  { %242 = shalt.err (!%p239_p7)
}
  0x10   :  { %s270_s22 = smov 256   ;;  %s271_s23 = smov 16  }
  0x11   :  { %22 = dma.hbm_to_vmem [thread:$0]  %s324_s0, 4096, %s17_s13, [#allocation4], %s270_s22, %s270_s22, %s271_s23  }
  0x12   :  { %265 = dma.done.wait [#allocation4], 4096  }
  0x13   :  { %266 = vsyncadd [#allocation4], 4294963200  ;;  %v272_v0 = vmov 0.0   ;;  %v31_v1 = vld [vmem:[#allocation3 + $0x8] sm:$0xff]  ;;  %v33_v2 = vld [vmem:[#allocation3 + $0x18] sm:$0xff]  ;;  %v64_v50 = vstv %s326_s2 }
  0x14   :  { %129 = vmatprep.mubr.f32.mxu0 %v272_v0  ;;  %v30_v3 = vld [vmem:[#allocation3] sm:$0xff]  ;;  %v176_v4 = vpack.c.bf16 %v33_v2, %v31_v1  ;;  %v32_v5 = vld [vmem:[#allocation3 + $0x10] sm:$0xff]  ;;  %v35_v6 = vld [vmem:[#allocation3 + $0x28] sm:$0xff] }
  0x15   :  { %v37_v7 = vld [vmem:[#allocation3 + $0x38] sm:$0xff]  ;;  %v178_v8 = vpack.c.bf16 %v32_v5, %v30_v3  ;;  %v34_v10 = vld [vmem:[#allocation3 + $0x20] sm:$0xff]  ;;  %v36_v11 = vld [vmem:[#allocation3 + $0x30] sm:$0xff] }
  0x16   :  { %v180_v9 = vpack.c.bf16 %v37_v7, %v35_v6  ;;  %v39_v12 = vld [vmem:[#allocation3 + $0x48] sm:$0xff]  ;;  %177 = vmatprep.subr.bf16.mxu0 %v176_v4  ;;  %v41_v13 = vld [vmem:[#allocation3 + $0x58] sm:$0xff]  ;;  %v182_v14 = vpack.c.bf16 %v36_v11, %v34_v10  ;;  %v38_v16 = vld [vmem:[#allocation3 + $0x40] sm:$0xff] }
  0x17   :  { %179 = vmatpush1.bf16.msra.mxu0 %v178_v8  ;;  %v184_v15 = vpack.c.bf16 %v41_v13, %v39_v12  ;;  %v40_v17 = vld [vmem:[#allocation3 + $0x50] sm:$0xff]  ;;  %v43_v18 = vld [vmem:[#allocation3 + $0x68] sm:$0xff]  ;;  %v45_v19 = vld [vmem:[#allocation3 + $0x78] sm:$0xff] }
  0x18   :  { %181 = vmatprep.subr.bf16.mxu0 %v180_v9  ;;  %v186_v20 = vpack.c.bf16 %v40_v17, %v38_v16  ;;  %v188_v21 = vpack.c.bf16 %v45_v19, %v43_v18  ;;  %v42_v22 = vld [vmem:[#allocation3 + $0x60] sm:$0xff]  ;;  %v44_v23 = vld [vmem:[#allocation3 + $0x70] sm:$0xff]  ;;  %v47_v24 = vld [vmem:[#allocation3 + $0x88] sm:$0xff] }
  0x19   :  { %v49_v25 = vld [vmem:[#allocation3 + $0x98] sm:$0xff]  ;;  %v190_v26 = vpack.c.bf16 %v44_v23, %v42_v22  ;;  %v46_v28 = vld [vmem:[#allocation3 + $0x80] sm:$0xff]  ;;  %v48_v29 = vld [vmem:[#allocation3 + $0x90] sm:$0xff] }
  0x1a   :  { %v192_v27 = vpack.c.bf16 %v49_v25, %v47_v24  ;;  %v51_v30 = vld [vmem:[#allocation3 + $0xa8] sm:$0xff]  ;;  %v53_v31 = vld [vmem:[#allocation3 + $0xb8] sm:$0xff]  ;;  %v194_v32 = vpack.c.bf16 %v48_v29, %v46_v28  ;;  %v50_v34 = vld [vmem:[#allocation3 + $0xa0] sm:$0xff] }
  0x1b   :  { %183 = vmatpush1.bf16.msra.mxu0 %v182_v14  ;;  %v196_v33 = vpack.c.bf16 %v53_v31, %v51_v30  ;;  %v52_v35 = vld [vmem:[#allocation3 + $0xb0] sm:$0xff]  ;;  %v55_v36 = vld [vmem:[#allocation3 + $0xc8] sm:$0xff]  ;;  %v57_v37 = vld [vmem:[#allocation3 + $0xd8] sm:$0xff] }
  0x1c   :  { %185 = vmatprep.subr.bf16.mxu0 %v184_v15  ;;  %v198_v38 = vpack.c.bf16 %v52_v35, %v50_v34  ;;  %v200_v39 = vpack.c.bf16 %v57_v37, %v55_v36  ;;  %v54_v40 = vld [vmem:[#allocation3 + $0xc0] sm:$0xff]  ;;  %v56_v41 = vld [vmem:[#allocation3 + $0xd0] sm:$0xff]  ;;  %v59_v42 = vld [vmem:[#allocation3 + $0xe8] sm:$0xff] }
  0x1d   :  { %v61_v43 = vld [vmem:[#allocation3 + $0xf8] sm:$0xff]  ;;  %v202_v44 = vpack.c.bf16 %v56_v41, %v54_v40  ;;  %v58_v46 = vld [vmem:[#allocation3 + $0xe0] sm:$0xff]  ;;  %v60_v47 = vld [vmem:[#allocation3 + $0xf0] sm:$0xff] }
  0x1e   :  { %v204_v45 = vpack.c.bf16 %v61_v43, %v59_v42  ;;  %v206_v48 = vpack.c.bf16 %v60_v47, %v58_v46  ;;  %v62_v49 = vld [vmem:[%s325_s1] sm:$0x3]  ;;  %s273_s1 = smov [#allocation6]  }
  0x1f   :  { %187 = vmatpush1.bf16.msra.mxu0 %v186_v20  ;;  %s166_s29 = sshll.u32 %s273_s1, 4  ;;  %s167_s29 = int_to_ptr.vmem [resolvable:$true] %s166_s29 }
  0x20   :  { %189 = vmatprep.subr.bf16.mxu0 %v188_v21  ;;  %s243_s2 = scalar_lea.vmem %s167_s29, 64  ;;  %p248_p9 = scmp.lt.s32.totalorder %s167_s29, %s167_s29 }
  0x21   :  { %p244_p8 = scmp.ne.s32.totalorder %s167_s29, %s243_s2  ;;  %p249_p10 = scmp.lt.s32.totalorder %s243_s2, %s243_s2 }
  0x23   :  { %191 = vmatpush1.bf16.msra.mxu0 %v190_v26  ;;  %p250_p11 = por %p249_p10, %p248_p9 }
  0x24   :  { %193 = vmatprep.subr.bf16.mxu0 %v192_v27 }
  0x25   :  { %p251_p12 = pnand %p250_p11, %p244_p8 }
  0x27   :  { %195 = vmatpush1.bf16.msra.mxu0 %v194_v32 }
  0x28   :  { %197 = vmatprep.subr.bf16.mxu0 %v196_v33 }
  0x2b   :  { %199 = vmatpush1.bf16.msra.mxu0 %v198_v38 }
  0x2c   :  { %201 = vmatprep.subr.bf16.mxu0 %v200_v39 }
  0x2f   :  { %203 = vmatpush1.bf16.msra.mxu0 %v202_v44 }
  0x30   :  { %205 = vmatprep.subr.bf16.mxu0 %v204_v45 }
  0x33   :  { %207 = vmatpush1.bf16.msra.mxu0 %v206_v48 }
  0x36   :  { %130 = vmatmul.mubr.f32.vlgmr.msra.gmra.mrb[0].mxu0 %v62_v49 }
 0x109   :  { %v131_v51 = vpop.f32.mrb[0].mxu0 }
 0x10a   :  { %v132_v52 = vadd.f32 %v131_v51, %v64_v50  ;;  %v133_v53 = vpop.f32.mrb[1].mxu0 }
 0x10b   :  { %v134_v54 = vadd.f32 %v133_v53, %v64_v50 }
 0x10c   :  { %v136_v55 = vsub.f32 0.0, %v132_v52 }
 0x10d   :  { %v137_v56 = vsub.f32 0.0, %v134_v54 }
 0x10e   :  { %v138_v57 = vmul.f32 1.442695, %v136_v55 }
 0x10f   :  { %v140_v58 = vmul.f32 1.442695, %v137_v56 }
 0x110   :  { %213 = vpow2.f32 %v138_v57 }
 0x111   :  { %215 = vpow2.f32 %v140_v58 }
 0x11a   :  { %v214_v59 = vpop.eup %213 }
 0x11b   :  { %v216_v60 = vpop.eup %215  ;;  %v142_v61 = vadd.f32 1.0, %v214_v59 }
 0x11c   :  { %v143_v62 = vadd.f32 1.0, %v216_v60 }
 0x11d   :  { %217 = vrcp.f32 %v142_v61 }
 0x11e   :  { %219 = vrcp.f32 %v143_v62 }
 0x127   :  { %v218_v63 = vpop.eup %217 }
 0x128   :  { %v220_v0 = vpop.eup %219 }
 0x129   :  { %v150_v1 = vcombine.low %v218_v63, %v220_v0 }
 0x12b   :  { %175 = vst.sshfl [vmem:[#allocation6] sm:$0x33 pattern:$0x76325410] %v150_v1 }
 0x12c   :  { %254 = shalt.err (!%p251_p12)
}
 0x12d   :  { %s255_s5 = scalar_lea.hbm %s327_s3, 64 }
 0x12e   :  { %p256_p13 = scmp.ne.s32.totalorder %s327_s3, %s255_s5  ;;  %p259_p0 = scmp.lt.u32.totalorder %s255_s5, %s327_s3 }
 0x130   :  { %p261_p1 = pnand %p259_p0, %p256_p13 }
 0x132   :  { %264 = shalt.err (!%p261_p1)
}
 0x133   :  { %169 = dma.vmem_to_hbm [thread:$0]  %s167_s29, 64, %s327_s3, [#allocation5]  }
 0x134   :  { %267 = dma.done.wait [#allocation5], 64  }
 0x135   :  { %268 = vsyncadd [#allocation5], 4294967232 }
 0x136   :  { %173 = vsyncpa [#allocation4], 1 }
 0x137   :  { %174 = vsyncpa [#allocation5], 1 }

</bundles_post_ra>
